<compile_context>
chip_gen: v7x
topology: tpu7x:2x2x1
jax: 0.10.0
libtpu: 0.0.40
codegen_flags: <defaults>
</compile_context>

<pallas_src>
import jax
import jax.numpy as jnp
from jax import lax
import numpy as np
from jax.experimental import pallas as pl
from jax.experimental.pallas import tpu as pltpu

# --- model hyperparameters (FastSpeech FFN defaults, small sizes) ------------
B = 2          # batch
T = 8          # sequence length
D_IN = 16      # d_in    (T * D_IN  = 128 -> lane-dense rows)
D_HID = 32     # d_hid   (T * D_HID = 256 -> lane-dense hidden rows)
K1, K2 = 9, 1          # kernel = (9, 1)
PAD1, PAD2 = 4, 0      # padding = (4, 0)  -> output length stays T
EPS = 1e-5             # nn.LayerNorm default eps


def ffn_kernel(x_ref, seg_ref, gamma_ref, beta_ref, w1_ref, b1_ref,
               w2_ref, b2_ref, out_ref):
    x = x_ref[...]                                      # (B, T*D_IN) f32
    seg = seg_ref[...]                                  # (T*D_IN, T*D_IN)

    # ---- LayerNorm over each D_IN-wide segment (== last dim of (B,T,D_IN)).
    # seg is block-diagonal with 1/D_IN, so x @ seg yields each segment's mean
    # broadcast back over that segment's lanes (biased variance, like torch).
    mean = jnp.dot(x, seg, preferred_element_type=jnp.float32)
    xc = x - mean
    var = jnp.dot(xc * xc, seg, preferred_element_type=jnp.float32)
    normed = xc * lax.rsqrt(var + EPS) * gamma_ref[...] + beta_ref[...]

    # ---- Conv1d #1 (kernel 9, padding 4): one block-Toeplitz matmul.
    h = jnp.dot(normed, w1_ref[...], preferred_element_type=jnp.float32)
    h = jnp.maximum(h + b1_ref[...], 0.0)               # bias + ReLU

    # ---- Conv1d #2 (kernel 1, padding 0): one block-diagonal matmul.
    y = jnp.dot(h, w2_ref[...], preferred_element_type=jnp.float32) + b2_ref[...]

    # ---- dropout (identity at eval) + residual; single lane-dense store.
    out_ref[...] = (y + x).astype(out_ref.dtype)


# --------------------- host-side parameter packing ---------------------------
def _conv1d_as_matrix(W, T_len, pad):
    """Fold a Conv1d weight (C_out, C_in, K) (PyTorch layout), stride 1, zero
    padding `pad` (output length == T_len) into a (T_len*C_in, T_len*C_out)
    block-Toeplitz matrix acting on the time-flattened channels-last input."""
    C_out, C_in, K = W.shape
    Wn = np.asarray(W, dtype=np.float32)
    big = np.zeros((T_len * C_in, T_len * C_out), dtype=np.float32)
    for t in range(T_len):          # output time step
        for k in range(K):          # kernel tap
            src = t + k - pad       # input time step feeding this tap
            if 0 <= src < T_len:
                big[src * C_in:(src + 1) * C_in,
                    t * C_out:(t + 1) * C_out] = Wn[:, :, k].T
    return jnp.asarray(big)


def _segment_mean_matrix(T_len, C):
    """(T_len*C, T_len*C) block-diagonal matrix of 1/C: x @ S == per-segment
    mean broadcast over each C-wide segment."""
    S = np.zeros((T_len * C, T_len * C), dtype=np.float32)
    for t in range(T_len):
        S[t * C:(t + 1) * C, t * C:(t + 1) * C] = 1.0 / C
    return jnp.asarray(S)


def ffn_forward(x, gamma, beta, W1, b1, W2, b2, pad1=PAD1, pad2=PAD2):
    """x: (B, T, D_IN); W1: (D_HID, D_IN, K1); W2: (D_IN, D_HID, K2) (PyTorch
    Conv1d layout); b1: (D_HID,); b2: (D_IN,); gamma/beta: (D_IN,)."""
    Bn, Tn, Din = x.shape
    Dhid = W1.shape[0]

    # One-time host-side packing: everything the kernel touches is lane-aligned
    # 2D, so the kernel body needs no reshapes / broadcasts / scratch.
    seg = _segment_mean_matrix(Tn, Din)              # (T*D_IN, T*D_IN)
    w1_big = _conv1d_as_matrix(W1, Tn, pad1)         # (T*D_IN,  T*D_HID)
    w2_big = _conv1d_as_matrix(W2, Tn, pad2)         # (T*D_HID, T*D_IN)
    gamma_t = jnp.asarray(np.tile(np.asarray(gamma, np.float32), Tn))[None, :]
    beta_t = jnp.asarray(np.tile(np.asarray(beta, np.float32), Tn))[None, :]
    b1_t = jnp.asarray(np.tile(np.asarray(b1, np.float32), Tn))[None, :]
    b2_t = jnp.asarray(np.tile(np.asarray(b2, np.float32), Tn))[None, :]

    x2d = x.reshape(Bn, Tn * Din)                    # (B, 128): lane-dense view

    vmem = pl.BlockSpec(memory_space=pltpu.MemorySpace.VMEM)   # whole array
    out2d = pl.pallas_call(
        ffn_kernel,
        out_shape=jax.ShapeDtypeStruct((Bn, Tn * Din), x.dtype),
        in_specs=[vmem] * 8,
        out_specs=vmem,
    )(x2d, seg, gamma_t, beta_t, w1_big, b1_t, w2_big, b2_t)

    return out2d.reshape(Bn, Tn, Din)


# ------------------------------- reference -----------------------------------
def reference_forward(x, gamma, beta, W1_oik, b1, W2_oik, b2):
    """Pure-JAX reference mirroring the PyTorch forward (eval mode)."""
    mean = jnp.mean(x, axis=-1, keepdims=True)
    var = jnp.mean((x - mean) ** 2, axis=-1, keepdims=True)
    out = (x - mean) / jnp.sqrt(var + EPS) * gamma + beta
    out = jnp.transpose(out, (0, 2, 1))                      # (B, d_in, T)
    out = lax.conv_general_dilated(
        out, W1_oik, window_strides=(1,), padding=[(PAD1, PAD1)],
        dimension_numbers=("NCH", "OIH", "NCH"),
        precision=lax.Precision.HIGHEST) + b1[None, :, None]
    out = jnp.maximum(out, 0.0)
    out = lax.conv_general_dilated(
        out, W2_oik, window_strides=(1,), padding=[(PAD2, PAD2)],
        dimension_numbers=("NCH", "OIH", "NCH"),
        precision=lax.Precision.HIGHEST) + b2[None, :, None]
    out = jnp.transpose(out, (0, 2, 1))                      # (B, T, d_in)
    return out + x                                           # dropout = identity


if __name__ == "__main__":
    key = jax.random.PRNGKey(0)
    kx, k1w, k1b, k2w, k2b, kg, kb = jax.random.split(key, 7)

    x = jax.random.normal(kx, (B, T, D_IN), dtype=jnp.float32)

    # Conv1d params in the PyTorch layout (out_ch, in_ch, kernel).
    fan1 = D_IN * K1
    W1 = jax.random.uniform(k1w, (D_HID, D_IN, K1), jnp.float32,
                            -1.0 / np.sqrt(fan1), 1.0 / np.sqrt(fan1))
    b1 = jax.random.uniform(k1b, (D_HID,), jnp.float32,
                            -1.0 / np.sqrt(fan1), 1.0 / np.sqrt(fan1))
    fan2 = D_HID * K2
    W2 = jax.random.uniform(k2w, (D_IN, D_HID, K2), jnp.float32,
                            -1.0 / np.sqrt(fan2), 1.0 / np.sqrt(fan2))
    b2 = jax.random.uniform(k2b, (D_IN,), jnp.float32,
                            -1.0 / np.sqrt(fan2), 1.0 / np.sqrt(fan2))

    # LayerNorm affine params (perturbed from the torch default ones/zeros so
    # the tiled gamma/beta path is actually exercised).
    gamma = 1.0 + 0.1 * jax.random.normal(kg, (D_IN,), jnp.float32)
    beta = 0.1 * jax.random.normal(kb, (D_IN,), jnp.float32)

    out = jax.block_until_ready(ffn_forward(x, gamma, beta, W1, b1, W2, b2))
    ref = jax.block_until_ready(reference_forward(x, gamma, beta, W1, b1, W2, b2))

    # Tolerance covers MXU default-precision rounding differences between the
    # fused Toeplitz-matmul path and XLA's convolution path; genuine indexing /
    # weight-packing bugs produce O(0.1-1) errors and would still be caught.
    np.testing.assert_allclose(np.asarray(out), np.asarray(ref),
                               rtol=2e-2, atol=2e-2)

    print("KERNEL_OK")
</pallas_src>

<mosaic_0001>
module attributes {stable_mosaic.version = 11 : i64} {
  func.func @ffn_kernel(%arg0: memref<2x128xf32, #tpu.memory_space<vmem>>, %arg1: memref<128x128xf32, #tpu.memory_space<vmem>>, %arg2: memref<1x128xf32, #tpu.memory_space<vmem>>, %arg3: memref<1x128xf32, #tpu.memory_space<vmem>>, %arg4: memref<128x256xf32, #tpu.memory_space<vmem>>, %arg5: memref<1x256xf32, #tpu.memory_space<vmem>>, %arg6: memref<256x128xf32, #tpu.memory_space<vmem>>, %arg7: memref<1x128xf32, #tpu.memory_space<vmem>>, %arg8: memref<2x128xf32, #tpu.memory_space<vmem>>) attributes {dimension_semantics = [], scalar_prefetch = 0 : i64, scratch_operands = 0 : i64, tpu.core_type = #tpu.core_type<tc>} {
    %c0 = arith.constant 0 : index
    %c0_0 = arith.constant 0 : index
    %0 = vector.load %arg0[%c0, %c0_0] : memref<2x128xf32, #tpu.memory_space<vmem>>, vector<2x128xf32>
    %c0_1 = arith.constant 0 : index
    %c0_2 = arith.constant 0 : index
    %1 = vector.load %arg1[%c0_1, %c0_2] : memref<128x128xf32, #tpu.memory_space<vmem>>, vector<128x128xf32>
    %cst = arith.constant dense<0.000000e+00> : vector<2x128xf32>
    %2 = tpu.matmul %0, %1, %cst {dimension_numbers = #tpu.dot_dimension_numbers<[1], [0], [0], [1], [0, 0, 1, 1], [], []>} : vector<2x128xf32>, vector<128x128xf32>, vector<2x128xf32> -> vector<2x128xf32>
    %3 = arith.subf %0, %2 : vector<2x128xf32>
    %4 = arith.mulf %3, %3 : vector<2x128xf32>
    %cst_3 = arith.constant dense<0.000000e+00> : vector<2x128xf32>
    %5 = tpu.matmul %4, %1, %cst_3 {dimension_numbers = #tpu.dot_dimension_numbers<[1], [0], [0], [1], [0, 0, 1, 1], [], []>} : vector<2x128xf32>, vector<128x128xf32>, vector<2x128xf32> -> vector<2x128xf32>
    %cst_4 = arith.constant 9.99999974E-6 : f32
    %6 = vector.broadcast %cst_4 : f32 to vector<2x128xf32>
    %7 = arith.addf %5, %6 : vector<2x128xf32>
    %8 = math.rsqrt %7 : vector<2x128xf32>
    %9 = arith.mulf %3, %8 : vector<2x128xf32>
    %c0_5 = arith.constant 0 : index
    %c0_6 = arith.constant 0 : index
    %10 = vector.load %arg2[%c0_5, %c0_6] : memref<1x128xf32, #tpu.memory_space<vmem>>, vector<1x128xf32>
    %11 = vector.broadcast %10 : vector<1x128xf32> to vector<2x128xf32>
    %12 = arith.mulf %9, %11 : vector<2x128xf32>
    %c0_7 = arith.constant 0 : index
    %c0_8 = arith.constant 0 : index
    %13 = vector.load %arg3[%c0_7, %c0_8] : memref<1x128xf32, #tpu.memory_space<vmem>>, vector<1x128xf32>
    %14 = vector.broadcast %13 : vector<1x128xf32> to vector<2x128xf32>
    %15 = arith.addf %12, %14 : vector<2x128xf32>
    %c0_9 = arith.constant 0 : index
    %c0_10 = arith.constant 0 : index
    %16 = vector.load %arg4[%c0_9, %c0_10] : memref<128x256xf32, #tpu.memory_space<vmem>>, vector<128x256xf32>
    %cst_11 = arith.constant dense<0.000000e+00> : vector<2x256xf32>
    %17 = tpu.matmul %15, %16, %cst_11 {dimension_numbers = #tpu.dot_dimension_numbers<[1], [0], [0], [1], [0, 0, 1, 1], [], []>} : vector<2x128xf32>, vector<128x256xf32>, vector<2x256xf32> -> vector<2x256xf32>
    %c0_12 = arith.constant 0 : index
    %c0_13 = arith.constant 0 : index
    %18 = vector.load %arg5[%c0_12, %c0_13] : memref<1x256xf32, #tpu.memory_space<vmem>>, vector<1x256xf32>
    %19 = vector.broadcast %18 : vector<1x256xf32> to vector<2x256xf32>
    %20 = arith.addf %17, %19 : vector<2x256xf32>
    %cst_14 = arith.constant 0.000000e+00 : f32
    %21 = vector.broadcast %cst_14 : f32 to vector<2x256xf32>
    %22 = arith.maximumf %20, %21 : vector<2x256xf32>
    %c0_15 = arith.constant 0 : index
    %c0_16 = arith.constant 0 : index
    %23 = vector.load %arg6[%c0_15, %c0_16] : memref<256x128xf32, #tpu.memory_space<vmem>>, vector<256x128xf32>
    %cst_17 = arith.constant dense<0.000000e+00> : vector<2x128xf32>
    %24 = tpu.matmul %22, %23, %cst_17 {dimension_numbers = #tpu.dot_dimension_numbers<[1], [0], [0], [1], [0, 0, 1, 1], [], []>} : vector<2x256xf32>, vector<256x128xf32>, vector<2x128xf32> -> vector<2x128xf32>
    %c0_18 = arith.constant 0 : index
    %c0_19 = arith.constant 0 : index
    %25 = vector.load %arg7[%c0_18, %c0_19] : memref<1x128xf32, #tpu.memory_space<vmem>>, vector<1x128xf32>
    %26 = vector.broadcast %25 : vector<1x128xf32> to vector<2x128xf32>
    %27 = arith.addf %24, %26 : vector<2x128xf32>
    %28 = arith.addf %27, %0 : vector<2x128xf32>
    %c0_20 = arith.constant 0 : index
    %c0_21 = arith.constant 0 : index
    %29 = vector.load %arg8[%c0_20, %c0_21] : memref<2x128xf32, #tpu.memory_space<vmem>>, vector<2x128xf32>
    tpu.vector_store %arg8[%c0_20, %c0_21], %28 {strides = array<i32>} : memref<2x128xf32, #tpu.memory_space<vmem>>, vector<2x128xf32>,
    return
  }
}

</mosaic_0001>

<bundles_post_ra>
// kernel: tpu_custom_call.1
= control target key start
LH: loop header
LB: loop body
LE: loop exit
PB: predicated region body
PF: predicated region fallthrough
CT: control target
= control target key end

     0   :  { %13 = vsyncpa [#allocation3], 0  ;;  %s1036_s0 = inlined_call_operand.hbm [shape: f32[2,128], index: 0, kind: input, shape index: {}]   ;;  %s1037_s1 = inlined_call_operand.hbm [shape: f32[128,128], index: 1, kind: input, shape index: {}]   ;;  %s1038_s2 = inlined_call_operand.vmem [shape: f32[1,128], index: 2, kind: input, shape index: {}]   ;;  %s1039_s3 = inlined_call_operand.vmem [shape: f32[1,128], index: 3, kind: input, shape index: {}]   ;;  %s1040_s4 = inlined_call_operand.hbm [shape: f32[128,256], index: 4, kind: input, shape index: {}]   ;;  %s1041_s5 = inlined_call_operand.vmem [shape: f32[1,256], index: 5, kind: input, shape index: {}]   ;;  %s1042_s6 = inlined_call_operand.hbm [shape: f32[256,128], index: 6, kind: input, shape index: {}]   ;;  %s1043_s7 = inlined_call_operand.vmem [shape: f32[1,128], index: 7, kind: input, shape index: {}]   ;;  %s1044_s8 = inlined_call_operand.hbm [shape: f32[2,128], index: 8, kind: output, shape index: {}]  }
   0x1   :  { %14 = vsyncpa [#allocation6], 0 }
   0x2   :  { %15 = vsyncpa [#allocation9], 0 }
   0x3   :  { %16 = vsyncpa [#allocation4], 0  ;;  %s891_s27 = smov [#allocation5]   ;;  %s773_s9 = scalar_lea.hbm %s1037_s1, 2048 }
   0x4   :  { %s32_s28 = sshll.u32 %s891_s27, 4  ;;  %p774_p0 = scmp.ne.s32.totalorder %s1037_s1, %s773_s9  ;;  %s33_s28 = int_to_ptr.vmem [resolvable:$true] %s32_s28 }
   0x5   :  { %p777_p1 = scmp.lt.u32.totalorder %s773_s9, %s1037_s1 }
   0x7   :  { %p779_p2 = pnand %p777_p1, %p774_p0 }
   0x9   :  { %782 = shalt.err (!%p779_p2)
}
   0xa   :  { %s783_s14 = scalar_lea.vmem %s33_s28, 2048  ;;  %p788_p4 = scmp.lt.s32.totalorder %s33_s28, %s33_s28 }
   0xb   :  { %p784_p3 = scmp.ne.s32.totalorder %s33_s28, %s783_s14  ;;  %p789_p5 = scmp.lt.s32.totalorder %s783_s14, %s783_s14 }
   0xd   :  { %p790_p6 = por %p789_p5, %p788_p4 }
   0xf   :  { %p791_p7 = pnand %p790_p6, %p784_p3 }
  0x11   :  { %794 = shalt.err (!%p791_p7)
}
  0x12   :  { %s892_s15 = smov 128   ;;  %s893_s16 = smov 8  }
  0x13   :  { %38 = dma.hbm_to_vmem [thread:$0]  %s1037_s1, 2048, %s33_s28, [#allocation6], %s892_s15, %s892_s15, %s893_s16  }
  0x14   :  { %s894_s19 = smov [#allocation2]   ;;  %s895_s21 = smov [#allocation7]  }
  0x15   :  { %s23_s20 = sshll.u32 %s894_s19, 4  ;;  %s48_s22 = sshll.u32 %s895_s21, 4  ;;  %s24_s20 = int_to_ptr.vmem [resolvable:$true] %s23_s20  ;;  %s49_s22 = int_to_ptr.vmem [resolvable:$true] %s48_s22 }
  0x16   :  { %s795_s25 = scalar_lea.hbm %s1036_s0, 32 }
  0x17   :  { %p796_p8 = scmp.ne.s32.totalorder %s1036_s0, %s795_s25  ;;  %p799_p9 = scmp.lt.u32.totalorder %s795_s25, %s1036_s0 }
  0x19   :  { %p801_p10 = pnand %p799_p9, %p796_p8 }
  0x1b   :  { %804 = shalt.err (!%p801_p10)
}
  0x1c   :  { %s805_s1 = scalar_lea.vmem %s24_s20, 32  ;;  %p810_p12 = scmp.lt.s32.totalorder %s24_s20, %s24_s20 }
  0x1d   :  { %p806_p11 = scmp.ne.s32.totalorder %s24_s20, %s805_s1  ;;  %p811_p13 = scmp.lt.s32.totalorder %s805_s1, %s805_s1 }
  0x1f   :  { %p812_p0 = por %p811_p13, %p810_p12 }
  0x21   :  { %p813_p1 = pnand %p812_p0, %p806_p11 }
  0x23   :  { %816 = shalt.err (!%p813_p1)
}
  0x24   :  { %26 = dma.hbm_to_vmem [thread:$0]  %s1036_s0, 32, %s24_s20, [#allocation3]  }
  0x25   :  { %s817_s12 = scalar_lea.hbm %s1040_s4, 4096 }
  0x26   :  { %p818_p2 = scmp.ne.s32.totalorder %s1040_s4, %s817_s12  ;;  %p821_p3 = scmp.lt.u32.totalorder %s817_s12, %s1040_s4 }
  0x28   :  { %p823_p4 = pnand %p821_p3, %p818_p2 }
  0x2a   :  { %826 = shalt.err (!%p823_p4)
}
  0x2b   :  { %s827_s19 = scalar_lea.vmem %s49_s22, 4096  ;;  %p832_p6 = scmp.lt.s32.totalorder %s49_s22, %s49_s22 }
  0x2c   :  { %p828_p5 = scmp.ne.s32.totalorder %s49_s22, %s827_s19  ;;  %p833_p7 = scmp.lt.s32.totalorder %s827_s19, %s827_s19 }
  0x2e   :  { %p834_p8 = por %p833_p7, %p832_p6 }
  0x30   :  { %p835_p9 = pnand %p834_p8, %p828_p5 }
  0x32   :  { %838 = shalt.err (!%p835_p9)
}
  0x33   :  { %s896_s0 = smov 256   ;;  %s897_s20 = smov 16  }
  0x34   :  { %54 = dma.hbm_to_vmem [thread:$0]  %s1040_s4, 4096, %s49_s22, [#allocation6], %s896_s0, %s896_s0, %s897_s20  }
  0x35   :  { %s898_s24 = smov [#allocation8]   ;;  %s839_s29 = scalar_lea.hbm %s1042_s6, 4096 }
  0x36   :  { %s62_s25 = sshll.u32 %s898_s24, 4  ;;  %p840_p10 = scmp.ne.s32.totalorder %s1042_s6, %s839_s29  ;;  %s63_s25 = int_to_ptr.vmem [resolvable:$true] %s62_s25 }
  0x37   :  { %p843_p11 = scmp.lt.u32.totalorder %s839_s29, %s1042_s6 }
  0x39   :  { %p845_p12 = pnand %p843_p11, %p840_p10 }
  0x3b   :  { %848 = shalt.err (!%p845_p12)
}
  0x3c   :  { %s849_s10 = scalar_lea.vmem %s63_s25, 4096  ;;  %p854_p0 = scmp.lt.s32.totalorder %s63_s25, %s63_s25 }
  0x3d   :  { %p850_p13 = scmp.ne.s32.totalorder %s63_s25, %s849_s10  ;;  %p855_p1 = scmp.lt.s32.totalorder %s849_s10, %s849_s10 }
  0x3f   :  { %p856_p2 = por %p855_p1, %p854_p0 }
  0x41   :  { %p857_p3 = pnand %p856_p2, %p850_p13 }
  0x43   :  { %860 = shalt.err (!%p857_p3)
}
  0x44   :  { %68 = dma.hbm_to_vmem [thread:$0]  %s1042_s6, 4096, %s63_s25, [#allocation9], %s892_s15, %s892_s15, %s893_s16  }
  0x45   :  { %883 = dma.done.wait [#allocation3], 32  }
  0x46   :  { %884 = vsyncadd [#allocation3], 4294967264 }
  0x47   :  { %885 = dma.done.wait [#allocation6], 6144  }
  0x48   :  { %886 = vsyncadd [#allocation6], 4294961152 }
  0x49   :  { %887 = dma.done.wait [#allocation9], 4096  }
  0x4a   :  { %888 = vsyncadd [#allocation9], 4294963200  ;;  %v899_v0 = vmov 0.0|0.0   ;;  %vm900_vm0 = vmmov 0   ;;  %v901_v1 = vmov 0.0   ;;  %v84_v2 = vld [vmem:[#allocation5] sm:$0xff] }
  0x4b   :  { %647 = vmatprep.subr.bf16.mxu0 %v899_v0  ;;  %609 = vmatprep.mubr.msk.f32.mxu0 %vm900_vm0, %v901_v1  ;;  %v85_v3 = vld [vmem:[#allocation5 + $0x8] sm:$0xff]  ;;  %v86_v4 = vld [vmem:[#allocation5 + $0x10] sm:$0xff]  ;;  %v87_v6 = vld [vmem:[#allocation5 + $0x18] sm:$0xff]  ;;  %s902_s14 = smov [#allocation10]  }
  0x4c   :  { %671 = vmatprep.subr.bf16.mxu1 %v899_v0  ;;  %644 = vmatprep.mubr.msk.f32.mxu1 %vm900_vm0, %v901_v1  ;;  %v648_v5 = vpack.c.bf16 %v85_v3, %v84_v2  ;;  %v651_v7 = vpack.c.bf16 %v87_v6, %v86_v4  ;;  %v88_v8 = vld [vmem:[#allocation5 + $0x20] sm:$0xff]  ;;  %v89_v9 = vld [vmem:[#allocation5 + $0x28] sm:$0xff]  ;;  %v90_v11 = vld [vmem:[#allocation5 + $0x30] sm:$0xff] }
  0x4d   :  { %v654_v10 = vpack.c.bf16 %v89_v9, %v88_v8  ;;  %v91_v12 = vld [vmem:[#allocation5 + $0x38] sm:$0xff]  ;;  %v92_v14 = vld [vmem:[#allocation5 + $0x40] sm:$0xff]  ;;  %v93_v15 = vld [vmem:[#allocation5 + $0x48] sm:$0xff] }
  0x4e   :  { %649 = vmatpush3.bf16.msra.mxu0 %v648_v5  ;;  %673 = vmatpush3.bf16.msra.mxu1 %v648_v5  ;;  %v657_v13 = vpack.c.bf16 %v91_v12, %v90_v11  ;;  %v660_v16 = vpack.c.bf16 %v93_v15, %v92_v14  ;;  %v94_v17 = vld [vmem:[#allocation5 + $0x50] sm:$0xff]  ;;  %v95_v18 = vld [vmem:[#allocation5 + $0x58] sm:$0xff]  ;;  %v96_v20 = vld [vmem:[#allocation5 + $0x60] sm:$0xff] }
  0x4f   :  { %650 = vmatprep.subr.bf16.mxu0 %v899_v0  ;;  %674 = vmatprep.subr.bf16.mxu1 %v899_v0  ;;  %v663_v19 = vpack.c.bf16 %v95_v18, %v94_v17  ;;  %v97_v21 = vld [vmem:[#allocation5 + $0x68] sm:$0xff]  ;;  %v98_v23 = vld [vmem:[#allocation5 + $0x70] sm:$0xff]  ;;  %v99_v24 = vld [vmem:[#allocation5 + $0x78] sm:$0xff] }
  0x50   :  { %v666_v22 = vpack.c.bf16 %v97_v21, %v96_v20  ;;  %v669_v25 = vpack.c.bf16 %v99_v24, %v98_v23  ;;  %v1002_v26 = vld [vmem:[#allocation2] sm:$0x3]  ;;  %v261_v27 = vld [vmem:[#allocation7 + $0x8] sm:$0xff]  ;;  %v260_v29 = vld [vmem:[#allocation7] sm:$0xff] }
  0x51   :  { %v263_v28 = vld [vmem:[#allocation7 + $0x18] sm:$0xff]  ;;  %v262_v31 = vld [vmem:[#allocation7 + $0x10] sm:$0xff]  ;;  %v265_v32 = vld [vmem:[#allocation7 + $0x28] sm:$0xff] }
  0x52   :  { %652 = vmatpush3.bf16.msra.mxu0 %v651_v7  ;;  %676 = vmatpush3.bf16.msra.mxu1 %v651_v7  ;;  %v695_v30 = vpack.c.bf16 %v263_v28, %v261_v27  ;;  %v267_v33 = vld [vmem:[#allocation7 + $0x38] sm:$0xff]  ;;  %v697_v34 = vpack.c.bf16 %v262_v31, %v260_v29  ;;  %v264_v36 = vld [vmem:[#allocation7 + $0x20] sm:$0xff]  ;;  %v266_v37 = vld [vmem:[#allocation7 + $0x30] sm:$0xff] }
  0x53   :  { %653 = vmatprep.subr.bf16.mxu0 %v899_v0  ;;  %677 = vmatprep.subr.bf16.mxu1 %v899_v0  ;;  %v699_v35 = vpack.c.bf16 %v267_v33, %v265_v32  ;;  %v269_v38 = vld [vmem:[#allocation7 + $0x48] sm:$0xff]  ;;  %v271_v39 = vld [vmem:[#allocation7 + $0x58] sm:$0xff]  ;;  %v701_v40 = vpack.c.bf16 %v266_v37, %v264_v36  ;;  %v268_v42 = vld [vmem:[#allocation7 + $0x40] sm:$0xff] }
  0x54   :  { %v703_v41 = vpack.c.bf16 %v271_v39, %v269_v38  ;;  %v270_v43 = vld [vmem:[#allocation7 + $0x50] sm:$0xff]  ;;  %v273_v49 = vld [vmem:[#allocation7 + $0x68] sm:$0xff]  ;;  %v275_v50 = vld [vmem:[#allocation7 + $0x78] sm:$0xff] }
  0x55   :  { %v705_v44 = vpack.c.bf16 %v270_v43, %v268_v42  ;;  %v707_v51 = vpack.c.bf16 %v275_v50, %v273_v49  ;;  %v272_v52 = vld [vmem:[#allocation7 + $0x60] sm:$0xff]  ;;  %v274_v53 = vld [vmem:[#allocation7 + $0x70] sm:$0xff]  ;;  %v277_v55 = vld [vmem:[#allocation7 + $0x88] sm:$0xff] }
  0x56   :  { %655 = vmatpush3.bf16.msra.mxu0 %v654_v10  ;;  %679 = vmatpush3.bf16.msra.mxu1 %v654_v10  ;;  %v709_v54 = vpack.c.bf16 %v274_v53, %v272_v52  ;;  %v279_v56 = vld [vmem:[#allocation7 + $0x98] sm:$0xff]  ;;  %v276_v58 = vld [vmem:[#allocation7 + $0x80] sm:$0xff]  ;;  %v278_v59 = vld [vmem:[#allocation7 + $0x90] sm:$0xff] }
  0x57   :  { %656 = vmatprep.subr.bf16.mxu0 %v899_v0  ;;  %680 = vmatprep.subr.bf16.mxu1 %v899_v0  ;;  %v711_v57 = vpack.c.bf16 %v279_v56, %v277_v55  ;;  %v713_v60 = vpack.c.bf16 %v278_v59, %v276_v58  ;;  %v281_v61 = vld [vmem:[#allocation7 + $0xa8] sm:$0xff]  ;;  %v283_v62 = vld [vmem:[#allocation7 + $0xb8] sm:$0xff]  ;;  %v280_v63 = vld [vmem:[#allocation7 + $0xa0] sm:$0xff] }
  0x58   :  { %v285_v2 = vld [vmem:[#allocation7 + $0xc8] sm:$0xff]  ;;  %v287_v3 = vld [vmem:[#allocation7 + $0xd8] sm:$0xff]  ;;  %v284_v6 = vld [vmem:[#allocation7 + $0xc0] sm:$0xff] }
  0x59   :  { %v719_v5 = vpack.c.bf16 %v287_v3, %v285_v2  ;;  %v286_v7 = vld [vmem:[#allocation7 + $0xd0] sm:$0xff]  ;;  %v289_v8 = vld [vmem:[#allocation7 + $0xe8] sm:$0xff]  ;;  %v291_v9 = vld [vmem:[#allocation7 + $0xf8] sm:$0xff] }
  0x5a   :  { %658 = vmatpush3.bf16.msra.mxu0 %v657_v13  ;;  %682 = vmatpush3.bf16.msra.mxu1 %v657_v13  ;;  %v721_v10 = vpack.c.bf16 %v286_v7, %v284_v6  ;;  %v723_v11 = vpack.c.bf16 %v291_v9, %v289_v8  ;;  %v288_v12 = vld [vmem:[#allocation7 + $0xe0] sm:$0xff]  ;;  %v290_v13 = vld [vmem:[#allocation7 + $0xf0] sm:$0xff]  ;;  %v396_v21 = vld [vmem:[#allocation8 + $0x98] sm:$0xff] }
  0x5b   :  { %659 = vmatprep.subr.bf16.mxu0 %v899_v0  ;;  %683 = vmatprep.subr.bf16.mxu1 %v899_v0  ;;  %v725_v14 = vpack.c.bf16 %v290_v13, %v288_v12  ;;  %v393_v15 = vld [vmem:[#allocation8 + $0x80] sm:$0xff]  ;;  %v395_v20 = vld [vmem:[#allocation8 + $0x90] sm:$0xff]  ;;  %v398_v28 = vld [vmem:[#allocation8 + $0xa8] sm:$0xff] }
  0x5c   :  { %v377_v17 = vld [vmem:[#allocation8] sm:$0xff]  ;;  %v731_v23 = vpack.c.bf16 %v396_v21, %v395_v20  ;;  %v379_v24 = vld [vmem:[#allocation8 + $0x10] sm:$0xff]  ;;  %v382_v32 = vld [vmem:[#allocation8 + $0x28] sm:$0xff] }
  0x5d   :  { %v397_v27 = vld [vmem:[#allocation8 + $0xa0] sm:$0xff]  ;;  %v399_v33 = vld [vmem:[#allocation8 + $0xb0] sm:$0xff]  ;;  %v384_v38 = vld [vmem:[#allocation8 + $0x38] sm:$0xff] }
  0x5e   :  { %661 = vmatpush3.bf16.msra.mxu0 %v660_v16  ;;  %685 = vmatpush3.bf16.msra.mxu1 %v660_v16  ;;  %v394_v16 = vld [vmem:[#allocation8 + $0x88] sm:$0xff]  ;;  %v381_v31 = vld [vmem:[#allocation8 + $0x20] sm:$0xff]  ;;  %v383_v37 = vld [vmem:[#allocation8 + $0x30] sm:$0xff] }
  0x5f   :  { %662 = vmatprep.subr.bf16.mxu0 %v899_v0  ;;  %686 = vmatprep.subr.bf16.mxu1 %v899_v0  ;;  %v727_v18 = vpack.c.bf16 %v394_v16, %v393_v15  ;;  %v401_v39 = vld [vmem:[#allocation8 + $0xc0] sm:$0xff]  ;;  %v387_v50 = vld [vmem:[#allocation8 + $0x50] sm:$0xff]  ;;  %v406_v53 = vld [vmem:[#allocation8 + $0xe8] sm:$0xff] }
  0x60   :  { %v385_v43 = vld [vmem:[#allocation8 + $0x40] sm:$0xff]  ;;  %v390_v2 = vld [vmem:[#allocation8 + $0x68] sm:$0xff]  ;;  %v391_v7 = vld [vmem:[#allocation8 + $0x70] sm:$0xff] }
  0x61   :  { %v405_v52 = vld [vmem:[#allocation8 + $0xe0] sm:$0xff]  ;;  %v392_v8 = vld [vmem:[#allocation8 + $0x78] sm:$0xff] }
  0x62   :  { %664 = vmatpush3.bf16.msra.mxu0 %v663_v19  ;;  %688 = vmatpush3.bf16.msra.mxu1 %v663_v19  ;;  %v378_v19 = vld [vmem:[#allocation8 + $0x8] sm:$0xff]  ;;  %v751_v55 = vpack.c.bf16 %v406_v53, %v405_v52  ;;  %v757_v9 = vpack.c.bf16 %v392_v8, %v391_v7  ;;  %v292_v12 = vld [vmem:[%s1041_s5] sm:$0x3]  ;;  %s494_s5 = sshll.u32 %s902_s14, 4  ;;  %s495_s5 = int_to_ptr.vmem [resolvable:$true] %s494_s5 }
  0x63   :  { %665 = vmatprep.subr.bf16.mxu0 %v899_v0  ;;  %689 = vmatprep.subr.bf16.mxu1 %v899_v0  ;;  %s861_s17 = scalar_lea.vmem %s495_s5, 32  ;;  %p866_p5 = scmp.lt.s32.totalorder %s495_s5, %s495_s5 }
  0x64   :  { %p862_p4 = scmp.ne.s32.totalorder %s495_s5, %s861_s17  ;;  %p867_p6 = scmp.lt.s32.totalorder %s861_s17, %s861_s17 }
  0x66   :  { %667 = vmatpush3.bf16.msra.mxu0 %v666_v22  ;;  %691 = vmatpush3.bf16.msra.mxu1 %v666_v22  ;;  %v729_v22 = vpack.c.bf16 %v378_v19, %v377_v17  ;;  %p868_p7 = por %p867_p6, %p866_p5 }
  0x67   :  { %668 = vmatprep.subr.bf16.mxu0 %v899_v0  ;;  %692 = vmatprep.subr.bf16.mxu1 %v899_v0  ;;  %v715_v0 = vpack.c.bf16 %v283_v62, %v281_v61  ;;  %v506_v62 = vld [vmem:[%s1039_s3] ss:$0 sm:$0xff] }
  0x68   :  { %p869_p8 = pnand %p868_p7, %p862_p4 }
  0x6a   :  { %670 = vmatpush3.bf16.msra.mxu0 %v669_v25  ;;  %694 = vmatpush3.bf16.msra.mxu1 %v669_v25  ;;  %v380_v25 = vld [vmem:[#allocation8 + $0x18] sm:$0xff] }
  0x6b   :  { %696 = vmatprep.subr.bf16.mxu0 %v695_v30  ;;  %728 = vmatprep.subr.bf16.mxu1 %v727_v18  ;;  %v733_v29 = vpack.c.bf16 %v380_v25, %v379_v24  ;;  %v735_v30 = vpack.c.bf16 %v398_v28, %v397_v27 }
  0x6d   :  { %610 = vmatmul.mubr.f32.vlgmr.msra.gmra.mrb[0].mxu0 %v1002_v26 }
  0x6e   :  { %368 = vmatprep.mubr.f32.mxu0 %v901_v1  ;;  %698 = vmatpush1.bf16.msra.mxu0 %v697_v34  ;;  %v282_v1 = vld [vmem:[#allocation7 + $0xb0] sm:$0xff]  ;;  %v400_v34 = vld [vmem:[#allocation8 + $0xb8] sm:$0xff] }
  0x6f   :  { %700 = vmatprep.subr.bf16.mxu0 %v699_v35  ;;  %v717_v4 = vpack.c.bf16 %v282_v1, %v280_v63  ;;  %v737_v35 = vpack.c.bf16 %v382_v32, %v381_v31  ;;  %v739_v36 = vpack.c.bf16 %v400_v34, %v399_v33  ;;  %v389_v1 = vld [vmem:[#allocation8 + $0x60] sm:$0xff] }
  0x70   :  { %v753_v3 = vpack.c.bf16 %v390_v2, %v389_v1 }
  0x72   :  { %702 = vmatpush1.bf16.msra.mxu0 %v701_v40  ;;  %v402_v40 = vld [vmem:[#allocation8 + $0xc8] sm:$0xff] }
  0x73   :  { %704 = vmatprep.subr.bf16.mxu0 %v703_v41  ;;  %v741_v41 = vpack.c.bf16 %v384_v38, %v383_v37  ;;  %v743_v42 = vpack.c.bf16 %v402_v40, %v401_v39 }
  0x76   :  { %706 = vmatpush1.bf16.msra.mxu0 %v705_v44  ;;  %v386_v44 = vld [vmem:[#allocation8 + $0x48] sm:$0xff] }
  0x77   :  { %708 = vmatprep.subr.bf16.mxu0 %v707_v51  ;;  %v388_v51 = vld [vmem:[#allocation8 + $0x58] sm:$0xff] }
  0x7a   :  { %710 = vmatpush1.bf16.msra.mxu0 %v709_v54  ;;  %v749_v54 = vpack.c.bf16 %v388_v51, %v387_v50 }
  0x7b   :  { %712 = vmatprep.subr.bf16.mxu0 %v711_v57 }
  0x7e   :  { %714 = vmatpush1.bf16.msra.mxu0 %v713_v60  ;;  %v505_v60 = vld [vmem:[%s1038_s2] ss:$0 sm:$0xff] }
  0x7f   :  { %716 = vmatprep.subr.bf16.mxu0 %v715_v0 }
  0x82   :  { %718 = vmatpush1.bf16.msra.mxu0 %v717_v4  ;;  %v407_v4 = vld [vmem:[#allocation8 + $0xf0] sm:$0xff] }
  0x83   :  { %720 = vmatprep.subr.bf16.mxu0 %v719_v5  ;;  %v408_v5 = vld [vmem:[#allocation8 + $0xf8] sm:$0xff] }
  0x84   :  { %v755_v6 = vpack.c.bf16 %v408_v5, %v407_v4 }
  0x86   :  { %722 = vmatpush1.bf16.msra.mxu0 %v721_v10 }
  0x87   :  { %724 = vmatprep.subr.bf16.mxu0 %v723_v11 }
  0x8a   :  { %726 = vmatpush1.bf16.msra.mxu0 %v725_v14 }
 0x140   :  { %v166_v45 = vpop.f32.mrb[0].mxu0 }
 0x141   :  { %v1006_v46 = vsub.f32 %v1002_v26, %v166_v45  ;;  %v611_v47 = vpop.f32.mrb[1].mxu0  ;;  %v403_v45 = vld [vmem:[#allocation8 + $0xd0] sm:$0xff] }
 0x142   :  { %v404_v47 = vld [vmem:[#allocation8 + $0xd8] sm:$0xff] }
 0x143   :  { %v171_v48 = vmul.f32 %v1006_v46, %v1006_v46  ;;  %v747_v49 = vpack.c.bf16 %v404_v47, %v403_v45 }
 0x145   :  { %645 = vmatmul.mubr.f32.vlgmr.msra.gmra.mrb[0].mxu1 %v171_v48  ;;  %v745_v48 = vpack.c.bf16 %v386_v44, %v385_v43 }
 0x146   :  { %730 = vmatpush3.bf16.msra.mxu1 %v729_v22 }
 0x147   :  { %732 = vmatprep.subr.bf16.mxu1 %v731_v23  ;;  %v507_v23 = vld [vmem:[%s1043_s7] ss:$0 sm:$0xff] }
 0x14a   :  { %734 = vmatpush3.bf16.msra.mxu1 %v733_v29 }
 0x14b   :  { %736 = vmatprep.subr.bf16.mxu1 %v735_v30 }
 0x14e   :  { %738 = vmatpush3.bf16.msra.mxu1 %v737_v35 }
 0x14f   :  { %740 = vmatprep.subr.bf16.mxu1 %v739_v36 }
 0x152   :  { %742 = vmatpush3.bf16.msra.mxu1 %v741_v41 }
 0x153   :  { %744 = vmatprep.subr.bf16.mxu1 %v743_v42 }
 0x156   :  { %746 = vmatpush3.bf16.msra.mxu1 %v745_v48 }
 0x157   :  { %748 = vmatprep.subr.bf16.mxu1 %v747_v49 }
 0x15a   :  { %750 = vmatpush3.bf16.msra.mxu1 %v749_v54 }
 0x15b   :  { %752 = vmatprep.subr.bf16.mxu1 %v751_v55 }
 0x15e   :  { %754 = vmatpush3.bf16.msra.mxu1 %v753_v3 }
 0x15f   :  { %756 = vmatprep.subr.bf16.mxu1 %v755_v6 }
 0x162   :  { %758 = vmatpush3.bf16.msra.mxu1 %v757_v9 }
 0x218   :  { %v238_v56 = vpop.f32.mrb[0].mxu1 }
 0x219   :  { %v239_v57 = vadd.f32 1e-05, %v238_v56  ;;  %v646_v58 = vpop.f32.mrb[1].mxu1 }
 0x21b   :  { %771 = vrsqrt.f32 %v239_v57 }
 0x225   :  { %v772_v59 = vpop.eup %771 }
 0x226   :  { %v243_v61 = vmul.f32 %v772_v59, %v1006_v46  ;;  %v294_v46 = vlaneseq }
 0x228   :  { %v251_v63 = vmul.f32 %v505_v60, %v243_v61  ;;  %v295_v10 = vshrl.u32 %v294_v46, 7 }
 0x22a   :  { %v259_v0 = vadd.f32 %v506_v62, %v251_v63  ;;  %v296_v11 = vsub.s32 0, %v295_v10  ;;  %v300_v13 = vsub.s32 1, %v295_v10 }
 0x22c   :  { %369 = vmatmul.mubr.f32.vlgmr.msra.gmra.mrb[2].mxu0 %v259_v0  ;;  %v297_v14 = vrot.slane %v292_v12, %v296_v11  ;;  %v301_v15 = vrot.slane %v292_v12, %v300_v13 }
 0x2ff   :  { %v370_v16 = vpop.f32.mrb[2].mxu0 }
 0x300   :  { %v371_v17 = vadd.f32 %v370_v16, %v297_v14  ;;  %v372_v18 = vpop.f32.mrb[3].mxu0 }
 0x301   :  { %v373_v19 = vadd.f32 %v372_v18, %v301_v15 }
 0x302   :  { %v375_v21 = vmax.f32 %v371_v17, 0.0 }
 0x303   :  { %v376_v20 = vmax.f32 %v373_v19, 0.0 }
 0x305   :  { %480 = vmatprep.mubr.f32.mxu1 %v376_v20 }
 0x306   :  { %481 = vmatmul.mubr.f32.vlgmr.msra.gmra.mrb[2].mxu1 %v375_v21 }
 0x3d9   :  { %v574_v22 = vpop.f32.mrb[2].mxu1 }
 0x3da   :  { %v575_v24 = vpop.f32.mrb[3].mxu1 }
 0x3db   :  { %v576_v25 = vadd.f32 %v575_v24, %v574_v22 }
 0x3dd   :  { %v483_v27 = vadd.f32 %v576_v25, %v507_v23 }
 0x3df   :  { %v486_v28 = vadd.f32 %v483_v27, %v1002_v26 }
 0x3e1   :  { %487 = vst [vmem:[#allocation10] sm:$0x3] %v486_v28 }
 0x3e2   :  { %872 = shalt.err (!%p869_p8)
}
 0x3e3   :  { %s873_s7 = scalar_lea.hbm %s1044_s8, 32 }
 0x3e4   :  { %p874_p9 = scmp.ne.s32.totalorder %s1044_s8, %s873_s7  ;;  %p877_p10 = scmp.lt.u32.totalorder %s873_s7, %s1044_s8 }
 0x3e6   :  { %p879_p11 = pnand %p877_p10, %p874_p9 }
 0x3e8   :  { %882 = shalt.err (!%p879_p11)
}
 0x3e9   :  { %497 = dma.vmem_to_hbm [thread:$0]  %s495_s5, 32, %s1044_s8, [#allocation4]  }
 0x3ea   :  { %889 = dma.done.wait [#allocation4], 32  }
 0x3eb   :  { %890 = vsyncadd [#allocation4], 4294967264 }
 0x3ec   :  { %501 = vsyncpa [#allocation3], 1 }
 0x3ed   :  { %502 = vsyncpa [#allocation6], 1 }
 0x3ee   :  { %503 = vsyncpa [#allocation9], 1 }
 0x3ef   :  { %504 = vsyncpa [#allocation4], 1 }

</bundles_post_ra>
